<compile_context>
chip_gen: v7x
topology: tpu7x:2x2x1
jax: 0.10.0
libtpu: 0.0.40
codegen_flags: <defaults>
</compile_context>

<pallas_src>
import jax
import jax.numpy as jnp
from jax.experimental import pallas as pl
from jax.experimental.pallas import tpu as pltpu

LANE = 128
ACC_SUB = 8  # f32 vreg sublane depth used by the accumulator


def _round_up(x, m):
    return ((x + m - 1) // m) * m


def _cdiv(a, b):
    return (a + b - 1) // b


def _l_color_kernel(x_ref, out_ref, acc_ref):
    """x_ref: (1, 3, TR, 128) input dtype; out_ref: (1, 1, 3, 128) f32 partial
    channel sums for this (batch, shard); acc_ref: (3, 8, 128) f32."""
    t = pl.program_id(2)

    @pl.when(t == 0)
    def _():
        acc_ref[...] = jnp.zeros_like(acc_ref)

    tr = x_ref.shape[2]
    tile = x_ref[0].astype(jnp.float32)                     # (3, TR, 128)
    # Keep the (8,128) vreg tiling: split the sublane dim and add vreg-wise.
    tile = tile.reshape(3, tr // ACC_SUB, ACC_SUB, LANE)
    acc_ref[...] += jnp.sum(tile, axis=1)                   # pure VPU adds

    @pl.when(t == pl.num_programs(2) - 1)
    def _():
        # One cross-sublane (XLU) reduce per (batch, shard).
        out_ref[...] = jnp.sum(acc_ref[...], axis=1)[None, None].astype(out_ref.dtype)


def l_color(x, *, block_bytes=3 << 20, num_shards=2):
    """Pallas equivalent of L_color.forward. x: (B, 3, H, W). Returns (B,1,1,1) f32."""
    B, C, H, W = x.shape
    assert C == 3, "L_color expects RGB input (B, 3, H, W)"
    HW = H * W
    itemsize = jnp.dtype(x.dtype).itemsize
    sub = max(ACC_SUB, 32 // itemsize)          # dtype-aware sublane multiple

    rows = _cdiv(HW, LANE)
    # Shard the reduction axis (helps v7x dual-TC at small batch); clamp so
    # every shard owns at least one full sublane group of real rows.
    shards = max(1, min(num_shards, rows // sub))
    per_shard = _cdiv(rows, shards)
    max_tile_rows = max(sub, (block_bytes // (C * LANE * itemsize)) // sub * sub)
    tile_rows = max(sub, min(max_tile_rows, _round_up(per_shard, sub)))
    n_tiles = _cdiv(rows, shards * tile_rows)
    rows_pad = shards * n_tiles * tile_rows
    hw_pad = rows_pad * LANE

    # Lane-dense layout; zero padding is sum-neutral (mean divides by true HW).
    x_flat = x.reshape(B, C, HW)
    if hw_pad != HW:
        x_flat = jnp.pad(x_flat, ((0, 0), (0, 0), (0, hw_pad - HW)))
    x_r = x_flat.reshape(B, C, rows_pad, LANE)

    cost = pl.CostEstimate(
        flops=B * C * hw_pad,
        transcendentals=0,
        bytes_accessed=B * C * hw_pad * itemsize + B * shards * C * LANE * 4,
    )

    partial = pl.pallas_call(
        _l_color_kernel,
        out_shape=jax.ShapeDtypeStruct((B, shards, C, LANE), jnp.float32),
        grid=(B, shards, n_tiles),
        in_specs=[
            pl.BlockSpec((1, C, tile_rows, LANE),
                         lambda b, s, t: (b, 0, s * n_tiles + t, 0)),
        ],
        out_specs=pl.BlockSpec((1, 1, C, LANE), lambda b, s, t: (b, s, 0, 0)),
        scratch_shapes=[pltpu.VMEM((C, ACC_SUB, LANE), jnp.float32)],
        compiler_params=pltpu.CompilerParams(
            dimension_semantics=("parallel", "parallel", "arbitrary"),
        ),
        cost_estimate=cost,
    )(x_r)

    # Tiny epilogue: cross-lane/shard reduce, mean, 4th powers, sqrt.
    sums = jnp.sum(partial, axis=(1, 3))                    # (B, 3)
    means = sums * jnp.float32(1.0 / HW)
    mr, mg, mb = means[:, 0], means[:, 1], means[:, 2]
    drg = (mr - mg) ** 2
    drb = (mr - mb) ** 2
    dgb = (mb - mg) ** 2
    k = jnp.sqrt(drg ** 2 + drb ** 2 + dgb ** 2)
    return k.reshape(B, 1, 1, 1)


def _l_color_ref(x):
    """Pure-JAX reference matching the PyTorch module."""
    mean_rgb = jnp.mean(x.astype(jnp.float32), axis=(2, 3), keepdims=True)  # (B,3,1,1)
    mr = mean_rgb[:, 0:1]
    mg = mean_rgb[:, 1:2]
    mb = mean_rgb[:, 2:3]
    drg = (mr - mg) ** 2
    drb = (mr - mb) ** 2
    dgb = (mb - mg) ** 2
    return jnp.sqrt(drg ** 2 + drb ** 2 + dgb ** 2)


if __name__ == "__main__":
    key = jax.random.PRNGKey(0)

    # Main case: small RGB batch, f32.
    B, C, H, W = 2, 3, 16, 16
    x = jax.random.uniform(key, (B, C, H, W), dtype=jnp.float32)
    k = l_color(x)
    jax.block_until_ready(k)
    k_ref = _l_color_ref(x)
    assert k.shape == (B, 1, 1, 1), k.shape
    assert jnp.allclose(k, k_ref, rtol=1e-5, atol=1e-6), (k, k_ref)

    # bf16 path (dtype-aware sublane tiling) and a non-128-multiple spatial size.
    xb = jax.random.uniform(jax.random.PRNGKey(1), (1, 3, 7, 17),
                            dtype=jnp.float32).astype(jnp.bfloat16)
    kb = l_color(xb)
    jax.block_until_ready(kb)
    kb_ref = _l_color_ref(xb)
    assert kb.shape == (1, 1, 1, 1), kb.shape
    assert jnp.allclose(kb, kb_ref, rtol=1e-3, atol=1e-5), (kb, kb_ref)

    print("KERNEL_OK")
</pallas_src>

<mosaic_0001>
module attributes {stable_mosaic.version = 11 : i64} {
  func.func @_l_color_kernel(%arg0: i32, %arg1: i32, %arg2: i32, %arg3: memref<1x3x8x128xf32, #tpu.memory_space<vmem>>, %arg4: memref<1x1x3x128xf32, #tpu.memory_space<vmem>>, %arg5: memref<3x8x128xf32, #tpu.memory_space<vmem>>) attributes {dimension_semantics = [#tpu.dimension_semantics<parallel>, #tpu.dimension_semantics<parallel>, #tpu.dimension_semantics<arbitrary>], iteration_bounds = array<i64: 2, 1, 1>, scalar_prefetch = 0 : i64, scratch_operands = 1 : i64, tpu.core_type = #tpu.core_type<tc>, window_params = [{transform_indices = @transform_0, window_bounds = array<i64: 1, 3, 8, 128>}, {transform_indices = @transform_1, window_bounds = array<i64: 1, 1, 3, 128>}]} {
    %c0_i32 = arith.constant 0 : i32
    %0 = arith.cmpi eq, %arg2, %c0_i32 : i32
    %1 = arith.extui %0 : i1 to i32
    %c0_i32_0 = arith.constant 0 : i32
    %2 = arith.cmpi ne, %1, %c0_i32_0 : i32
    scf.if %2 {
      %cst_12 = arith.constant 0.000000e+00 : f32
      %13 = vector.broadcast %cst_12 : f32 to vector<3x8x128xf32>
      %c0_13 = arith.constant 0 : index
      %c0_14 = arith.constant 0 : index
      %c0_15 = arith.constant 0 : index
      %14 = vector.load %arg5[%c0_13, %c0_14, %c0_15] : memref<3x8x128xf32, #tpu.memory_space<vmem>>, vector<3x8x128xf32>
      tpu.vector_store %arg5[%c0_13, %c0_14, %c0_15], %13 {strides = array<i32>} : memref<3x8x128xf32, #tpu.memory_space<vmem>>, vector<3x8x128xf32>,
    } else {
    }
    %c0 = arith.constant 0 : index
    %c0_1 = arith.constant 0 : index
    %c0_2 = arith.constant 0 : index
    %c0_3 = arith.constant 0 : index
    %3 = vector.load %arg3[%c0, %c0_1, %c0_2, %c0_3] : memref<1x3x8x128xf32, #tpu.memory_space<vmem>>, vector<1x3x8x128xf32>
    %4 = vector.shape_cast %3 : vector<1x3x8x128xf32> to vector<3x8x128xf32>
    %5 = vector.shape_cast %4 : vector<3x8x128xf32> to vector<3x1x8x128xf32>
    %c0_4 = arith.constant 0 : index
    %c0_5 = arith.constant 0 : index
    %c0_6 = arith.constant 0 : index
    %6 = vector.load %arg5[%c0_4, %c0_5, %c0_6] : memref<3x8x128xf32, #tpu.memory_space<vmem>>, vector<3x8x128xf32>
    %cst = arith.constant dense<0.000000e+00> : vector<3x8x128xf32>
    %7 = vector.multi_reduction <add>, %5, %cst [1] : vector<3x1x8x128xf32> to vector<3x8x128xf32>
    %8 = arith.addf %6, %7 : vector<3x8x128xf32>
    %c0_7 = arith.constant 0 : index
    %c0_8 = arith.constant 0 : index
    %c0_9 = arith.constant 0 : index
    %9 = vector.load %arg5[%c0_7, %c0_8, %c0_9] : memref<3x8x128xf32, #tpu.memory_space<vmem>>, vector<3x8x128xf32>
    tpu.vector_store %arg5[%c0_7, %c0_8, %c0_9], %8 {strides = array<i32>} : memref<3x8x128xf32, #tpu.memory_space<vmem>>, vector<3x8x128xf32>,
    %c0_i32_10 = arith.constant 0 : i32
    %10 = arith.cmpi eq, %arg2, %c0_i32_10 : i32
    %11 = arith.extui %10 : i1 to i32
    %c0_i32_11 = arith.constant 0 : i32
    %12 = arith.cmpi ne, %11, %c0_i32_11 : i32
    scf.if %12 {
      %c0_12 = arith.constant 0 : index
      %c0_13 = arith.constant 0 : index
      %c0_14 = arith.constant 0 : index
      %13 = vector.load %arg5[%c0_12, %c0_13, %c0_14] : memref<3x8x128xf32, #tpu.memory_space<vmem>>, vector<3x8x128xf32>
      %cst_15 = arith.constant dense<0.000000e+00> : vector<3x128xf32>
      %14 = vector.multi_reduction <add>, %13, %cst_15 [1] : vector<3x8x128xf32> to vector<3x128xf32>
      %15 = vector.shape_cast %14 : vector<3x128xf32> to vector<1x1x3x128xf32>
      %c0_16 = arith.constant 0 : index
      %c0_17 = arith.constant 0 : index
      %c0_18 = arith.constant 0 : index
      %c0_19 = arith.constant 0 : index
      %16 = vector.load %arg4[%c0_16, %c0_17, %c0_18, %c0_19] : memref<1x1x3x128xf32, #tpu.memory_space<vmem>>, vector<1x1x3x128xf32>
      tpu.vector_store %arg4[%c0_16, %c0_17, %c0_18, %c0_19], %15 {strides = array<i32>} : memref<1x1x3x128xf32, #tpu.memory_space<vmem>>, vector<1x1x3x128xf32>,
    } else {
    }
    return
  }
  func.func @transform_0(%arg0: i32, %arg1: i32, %arg2: i32) -> (i32, i32, i32, i32) {
    %c1_i32 = arith.constant 1 : i32
    %0 = arith.muli %arg1, %c1_i32 : i32
    %1 = arith.addi %0, %arg2 : i32
    %c0_i32 = arith.constant 0 : i32
    %c0_i32_0 = arith.constant 0 : i32
    %c0_i32_1 = arith.constant 0 : i32
    return %arg0, %c0_i32, %1, %c0_i32_0 : i32, i32, i32, i32
  }
  func.func @transform_1(%arg0: i32, %arg1: i32, %arg2: i32) -> (i32, i32, i32, i32) {
    %c0_i32 = arith.constant 0 : i32
    %c0_i32_0 = arith.constant 0 : i32
    %c0_i32_1 = arith.constant 0 : i32
    return %arg0, %arg1, %c0_i32, %c0_i32_0 : i32, i32, i32, i32
  }
}

</mosaic_0001>

<bundles_post_ra>
// kernel: tpu_custom_call.1
= control target key start
LH: loop header
LB: loop body
LE: loop exit
PB: predicated region body
PF: predicated region fallthrough
CT: control target
= control target key end

     0   :  { %6 = vsyncpa [#allocation4], 0  ;;  %s595_s0 = inlined_call_operand.hbm [shape: f32[2,3,8,128], index: 0, kind: input, shape index: {}]   ;;  %s596_s1 = inlined_call_operand.vmem [shape: f32[2,1,3,128], index: 1, kind: output, shape index: {}]  }
   0x1   :  { %8 = vsyncpa [#allocation4 + $0x1], 0  ;;  %s477_s6 = smov 0   ;;  %s479_s7 = smov 0  }
   0x2   :  { %s481_s8 = smov 0   ;;  %s483_s9 = smov 0  }
   0x3   :  { %s485_s10 = smov 0   ;;  %s487_s11 = smov 0  }
   0x4 LB: > { %s313_s12 = sadd.s32 4294967295, %s462_s11   ;;  %s33_s13 = sadd.s32 1, %s458_s10  ;;  %s462_s11 = sphi %s487_s11, %s14_s11   ;;  %s458_s10 = sphi %s485_s10, %s603_s10   ;;  %s454_s9 = sphi %s483_s9, %s602_s9   ;;  %s450_s8 = sphi %s481_s8, %s601_s8   ;;  %s446_s7 = sphi %s479_s7, %s600_s7   ;;  %s442_s6 = sphi %s477_s6, %s599_s6  }
   0x5   : > { %p35_p0 = scmp.ge.s32.totalorder %s33_s13, 2  ;;  %s44_s14 = sadd.s32 1, %s450_s8 }
   0x6   : > { %p51_p1 = scmp.ne.s32.totalorder %s450_s8, %s446_s7  ;;  %p52_p2 = scmp.eq.s32.totalorder %s462_s11, 0 }
   0x7   : > { %s605_s13 = smov (%p35_p0, %s33_s13), 0  ;;  %p57_p4 = scmp.ne.s32.totalorder %s446_s7, %s442_s6 }
   0x8   : > { %p53_p3 = por %p52_p2, %p51_p1  ;;  %s39_s15 = ssub.s32 %s458_s10, %s605_s13 }
   0x9   : > { %p58_p5 = scmp.eq.s32.totalorder %s313_s12, 0  ;;  %p42_p6 = scmp.eq.s32.totalorder %s39_s15, 0 }
   0xa   : > { %p331_p8 = scmp.lt.s32.totalorder %s462_s11, 2  ;;  %s109_s18 = sand.u32 1, %s450_s8  }
   0xb   : > { %p516_p7 = por %p58_p5, %p57_p4  ;;  %s323_s19 = smul.u32 384, %s458_s10 }
   0xc   : > { %s522_s17 = scalar_select %p42_p6, %s450_s8, %s44_s14  }
   0xd   : > { %s322_s20 = smul.u32 24, %s109_s18  ;;  %s529_s23 = scalar_lea.hbm %s595_s0, %s323_s19 }
   0xe   : > { %p531_p9 = pnand %p331_p8, %p53_p3  ;;  %s537_s27 = scalar_lea.sflag [#allocation4], %s109_s18 }
   0xf   : > { %s113_s25 = scalar_lea.vmem [#allocation3], %s322_s20  ;;  %s382_s28 = scalar_lea.hbm %s529_s23, 384 }
  0x10   : > { %s122_s26 = sshll.u32 %s113_s25, 4  ;;  %p383_p10 = scmp.ne.s32.totalorder %s529_s23, %s382_s28  ;;  %s535_s26 = int_to_ptr.vmem [resolvable:$true] %s122_s26 }
  0x11   : > { %p384_p11 = pneg %p531_p9  ;;  %s387_s2 = scalar_lea.hbm %s595_s0, 768 }
  0x12   : > { %p388_p0 = scmp.lt.u32.totalorder %s529_s23, %s595_s0  ;;  %p389_p1 = scmp.lt.u32.totalorder %s387_s2, %s382_s28 }
  0x13   : > { %p385_p12 = pnand %p384_p11, %p383_p10  ;;  %p391_p3 = scmp.lt.u32.totalorder %s382_s28, %s529_s23 }
  0x14   : > { %p390_p2 = por %p389_p1, %p388_p0 }
  0x15   : > { %p386_p13 = pneg %p385_p12 }
  0x16   : > { %p392_p4 = por %p391_p3, %p390_p2 }
  0x18   : > { %p393_p5 = pnand %p392_p4, %p386_p13 }
  0x1a   : > { %396 = shalt.err (!%p393_p5)
}
  0x1b   : > { %s397_s5 = scalar_lea.vmem %s535_s26, 384  ;;  %s464_s6 = smov [#allocation3]  }
  0x1c   : > { %p398_p6 = scmp.ne.s32.totalorder %s535_s26, %s397_s5  ;;  %s402_s12 = sshll.u32 %s464_s6, 4  ;;  %s403_s12 = int_to_ptr.vmem [resolvable:$false] %s402_s12 }
  0x1d   : > { %s404_s14 = scalar_lea.vmem %s403_s12, 768  ;;  %p405_p12 = scmp.lt.s32.totalorder %s535_s26, %s403_s12 }
  0x1e   : > { %p400_p8 = pnand %p398_p6, %p384_p11  ;;  %p406_p0 = scmp.lt.s32.totalorder %s404_s14, %s397_s5 }
  0x20   : > { %p401_p10 = pneg %p400_p8  ;;  %p407_p1 = por %p406_p0, %p405_p12 }
  0x22   : > { %p408_p2 = pnand %p407_p1, %p401_p10 }
  0x24   : > { %411 = shalt.err (!%p408_p2)
}
  0x25   : > { %s465_s15 = smov 128   ;;  %s466_s18 = smov 8  }
  0x26   : > { %330 = dma.hbm_to_vmem [thread:$0]  (!%p531_p9), %s529_s23, 384, %s535_s26, %s537_s27, %s465_s15, %s465_s15, %s466_s18  }
  0x27   : > { %p318_p11 = scmp.ge.s32.totalorder %s462_s11, 1  ;;  %p130_p13 = scmp.lt.s32.totalorder %s462_s11, 3 }
  0x29   : > { %p131_p3 = pnand %p318_p11, %p130_p13 }
  0x2a   : > { %s136_s19 = sand.u32 (!%p131_p3), 1, %s446_s7  }
  0x2b   : > { %134 = sbr.rel (%p131_p3) target bundleno = 67 (0x43), region = 24  ;;  %s137_s21 = scalar_lea.sflag (!%p131_p3), [#allocation4], %s136_s19 }
  0x2c   : > { %s324_s20 = smul.u32 (!%p131_p3), 24, %s136_s19 }
  0x2e   : > { %s140_s22 = scalar_lea.vmem (!%p131_p3), [#allocation3], %s324_s20 }
  0x32   : > { %437 = dma.done.wait (%p516_p7), %s137_s21, 384  }
  0x33   : > { %439 = vsyncadd (%p516_p7), %s137_s21, 4294966912  ;;  %v176_v0 = vld [vmem:[%s140_s22] sm:$0xff]  ;;  %v177_v1 = vld [vmem:[%s140_s22 + $0x8] sm:$0xff]  ;;  %p162_p9 = scmp.lt.s32.totalorder %s454_s9, 1  ;;  %vm218_vm0 = vcmask 1041409   ;;  %vm220_vm1 = vcmask 1042434  }
  0x34   : > { %v178_v2 = vld [vmem:[%s140_s22 + $0x10] sm:$0xff]  ;;  %v197_v3 = vrot.slane %v176_v0, 4  ;;  %v203_v4 = vrot.slane %v177_v1, 4 }
  0x35   : > { %v209_v5 = vrot.slane %v178_v2, 4  ;;  %s607_s9 = smov (!%p162_p9, %s454_s9), 1 }
  0x36   : > { %v198_v6 = vadd.f32 %v197_v3, %v176_v0  ;;  %v204_v7 = vadd.f32 %v203_v4, %v177_v1  ;;  %s319_s16 = sshll.u32 %s607_s9, 2 }
  0x37   : > { %v210_v8 = vadd.f32 %v209_v5, %v178_v2  ;;  %s168_s25 = scalar_lea.vmem %s596_s1, %s319_s16 }
  0x38   : > { %v199_v9 = vrot.slane %v198_v6, 2  ;;  %v205_v10 = vrot.slane %v204_v7, 2 }
  0x39   : > { %v211_v11 = vrot.slane %v210_v8, 2 }
  0x3a   : > { %v200_v12 = vadd.f32 %v199_v9, %v198_v6  ;;  %v206_v13 = vadd.f32 %v205_v10, %v204_v7 }
  0x3b   : > { %v212_v14 = vadd.f32 %v211_v11, %v210_v8 }
  0x3c   : > { %v201_v15 = vrot.slane %v200_v12, 1  ;;  %v207_v16 = vrot.slane %v206_v13, 1 }
  0x3d   : > { %v213_v17 = vrot.slane %v212_v14, 1 }
  0x3e   : > { %v202_v18 = vadd.f32 %v201_v15, %v200_v12  ;;  %v208_v19 = vadd.f32 %v207_v16, %v206_v13 }
  0x3f   : > { %v214_v20 = vadd.f32 %v213_v17, %v212_v14 }
  0x40   : > { %v219_v21 = vsel %vm218_vm0, %v208_v19, %v202_v18 }
  0x41   : > { %v221_v22 = vsel %vm220_vm1, %v214_v20, %v219_v21 }
  0x42   : > { %223 = vst [vmem:[%s168_s25] sm:$0x7] %v221_v22 }
  0x43 PF: > { %s14_s11 = sadd.s32 1, %s462_s11   ;;  %s599_s6 = smov %s446_s7 }
  0x44   : > { %p11_p7 = scmp.ge.s32.totalorder %s14_s11, 4   ;;  %s600_s7 = smov %s450_s8 }
  0x45   : > { %s601_s8 = smov %s522_s17  ;;  %s602_s9 = smov %s458_s10 }
  0x46   : > { %s603_s10 = smov %s605_s13  ;;  %13 = sbr.rel (!%p11_p7) target bundleno = 4 (0x4), region = 72 }
  0x4d   :  { %249 = vsyncpa [#allocation4], 1 }
  0x4e   :  { %251 = vsyncpa [#allocation4 + $0x1], 1 }

</bundles_post_ra>
